<compile_context>
chip_gen: v7x
topology: tpu7x:2x2x1
jax: 0.10.0
libtpu: 0.0.40
codegen_flags: <defaults>
</compile_context>

<pallas_src>
import math

import jax
import jax.numpy as jnp
from jax import lax
from jax.experimental import pallas as pl
from jax.experimental.pallas import tpu as pltpu


_GELU_C = 1.5957691216057308  # 2 * sqrt(2 / pi)


def _gelu(x):
    # tanh-GELU written via the identity 0.5*(1+tanh(a)) == sigmoid(2a):
    # a single EUP transcendental per element, negligible VALU work.
    return x * jax.nn.sigmoid(_GELU_C * (x + 0.044715 * x * x * x))


# ----------------------------------------------------------------------------
# Fused kernel.  Grid = (batch_blocks, n_layers); the layer axis is innermost
# and "arbitrary", the batch-block axis is "parallel" (megacore shardable).
# Activation layout inside a block: b-major rows, (B_tile * H, L), L on lanes.
# ----------------------------------------------------------------------------
def _make_s4_stack_kernel(n_heads, b_tile, seq_len):
    H, Bt, L = n_heads, b_tile, seq_len

    def kernel(u_ref, k_ref, d_ref, w_ref, bc_ref, g_ref, beta_ref,
               o_ref, y_scr):
        layer = pl.program_id(1)

        # o_ref is the VMEM-resident activation carry.  NOTE: correctness of
        # this pattern relies on (a) the layer grid axis being innermost and
        # (b) the output index_map being constant over it, so the block is
        # only written back to HBM when the batch-block index changes.
        @pl.when(layer == 0)
        def _():
            o_ref[...] = u_ref[...]          # load the activation once per block

        # Causal mask for the Toeplitz band, hoisted out of the head loop.
        row = lax.broadcasted_iota(jnp.int32, (L, L), 0)
        col = lax.broadcasted_iota(jnp.int32, (L, L), 1)
        causal = col >= row

        # ---- depthwise causal SSM conv per head, on the MXU ----------------
        # y[b, l] = sum_{j<=l} u[b, j] * k[l-j]  ==  u (Bt, L) @ T (L, L),
        # with T[j, l] = k[l-j] for l >= j else 0, built in-kernel from k.
        def head_body(h, carry):
            k_row = k_ref[pl.ds(h, 1), :]                         # (1, L) f32
            circ = pltpu.roll(jnp.broadcast_to(k_row, (L, L)),
                              0, 1, stride=1, stride_axis=0)      # row j -> roll(k, j)
            toep = jnp.where(causal, circ, 0.0).astype(jnp.bfloat16)
            u_h = o_ref[pl.ds(h, Bt, stride=H), :]                # (Bt, L), b-major rows
            conv = jnp.dot(u_h.astype(jnp.bfloat16), toep,
                           preferred_element_type=jnp.float32)    # (Bt, L) f32
            y_scr[pl.ds(h * Bt, Bt), :] = conv                    # h-major scratch
            return carry

        lax.fori_loop(0, H, head_body, None)

        # Per-layer params, loaded once per layer from the resident tensors.
        w_l = w_ref[layer]            # (2H, H) bf16
        bc_l = bc_ref[layer]          # (2H, 1) f32
        d_l = d_ref[layer]            # (H, 1)  f32
        g_l = g_ref[layer]            # (H, 1)  f32
        beta_l = beta_ref[layer]      # (H, 1)  f32

        # ---- D skip + GELU + 1x1 conv (H->2H) + GLU + residual + LayerNorm -
        def batch_body(b, carry):
            rows = pl.ds(pl.multiple_of(b * H, H), H)
            u_b = o_ref[rows, :]                                  # (H, L) layer input
            conv_b = y_scr[pl.ds(b, H, stride=Bt), :]             # (H, L) conv result
            y = _gelu(conv_b + d_l * u_b)
            v = jnp.dot(w_l, y.astype(jnp.bfloat16),
                        preferred_element_type=jnp.float32) + bc_l    # (2H, L)
            z = v[:H, :] * jax.nn.sigmoid(v[H:, :])               # GLU over channels
            xn = z + u_b                                          # residual
            mean = jnp.mean(xn, axis=0, keepdims=True)
            xc = xn - mean
            var = jnp.mean(xc * xc, axis=0, keepdims=True)        # centered variance
            o_ref[rows, :] = g_l * (xc * lax.rsqrt(var + 1e-5)) + beta_l
            return carry

        lax.fori_loop(0, Bt, batch_body, None)

    return kernel


def s4_stack(u, k, D, W, bconv, gamma, beta, *, b_tile=None):
    """u: (B, H, L) f32; k: (n_layers, H, L) f32.  Returns (B, H, L) f32."""
    B, H, L = u.shape
    n_layers = k.shape[0]
    if b_tile is None:
        b_tile = B if B <= 8 else 8   # TODO(synk): raise toward 64-256 at scale
    assert B % b_tile == 0, "B must be divisible by b_tile"
    assert H % 8 == 0 and L % 128 == 0, "need H % 8 == 0 and L % 128 == 0"
    Bt = b_tile
    n_bb = B // Bt

    # b-major rows inside each batch block: row = b_local * H + h.
    u_blk = u.reshape(n_bb, Bt * H, L)

    kernel = _make_s4_stack_kernel(H, Bt, L)
    out = pl.pallas_call(
        kernel,
        out_shape=jax.ShapeDtypeStruct((n_bb, Bt * H, L), jnp.float32),
        grid_spec=pltpu.PrefetchScalarGridSpec(
            num_scalar_prefetch=0,
            grid=(n_bb, n_layers),
            in_specs=[
                # activation input (only read at layer 0)
                pl.BlockSpec((None, Bt * H, L), lambda bb, li: (bb, 0, 0)),
                # SSM kernel k, streamed one layer slice per step
                pl.BlockSpec((None, H, L), lambda bb, li: (li, 0, 0)),
                # small per-layer params: full tensors, constant index maps
                # (loaded once, VMEM resident across the whole grid)
                pl.BlockSpec((n_layers, H, 1), lambda bb, li: (0, 0, 0)),      # D
                pl.BlockSpec((n_layers, 2 * H, H), lambda bb, li: (0, 0, 0)),  # W
                pl.BlockSpec((n_layers, 2 * H, 1), lambda bb, li: (0, 0, 0)),  # conv bias
                pl.BlockSpec((n_layers, H, 1), lambda bb, li: (0, 0, 0)),      # ln gamma
                pl.BlockSpec((n_layers, H, 1), lambda bb, li: (0, 0, 0)),      # ln beta
            ],
            # Constant over the layer axis => this block carries the activation.
            out_specs=pl.BlockSpec((None, Bt * H, L), lambda bb, li: (bb, 0, 0)),
            scratch_shapes=[pltpu.VMEM((H * Bt, L), jnp.float32)],  # conv result
        ),
        compiler_params=pltpu.CompilerParams(
            dimension_semantics=("parallel", "arbitrary"),
            vmem_limit_bytes=48 * 1024 * 1024),
    )(u_blk, k, D, W, bconv, gamma, beta)
    return out.reshape(B, H, L)


# ----------------------------------------------------------------------------
# Parameter setup + S4D kernel materialization (plain-JAX glue, outside Pallas)
# ----------------------------------------------------------------------------
def init_s4_layer_params(key, d_model, n_layers, d_state=64,
                         dt_min=1e-3, dt_max=1e-1):
    H, N2 = d_model, d_state // 2
    params = []
    for i in range(n_layers):
        keys = jax.random.split(jax.random.fold_in(key, i), 6)
        log_dt = (jax.random.uniform(keys[0], (H,), dtype=jnp.float32)
                  * (math.log(dt_max) - math.log(dt_min)) + math.log(dt_min))
        c_scale = math.sqrt(0.5)  # torch complex randn: re/im ~ N(0, 1/2)
        C_re = jax.random.normal(keys[1], (H, N2), dtype=jnp.float32) * c_scale
        C_im = jax.random.normal(keys[2], (H, N2), dtype=jnp.float32) * c_scale
        log_A_real = jnp.log(0.5 * jnp.ones((H, N2), dtype=jnp.float32))
        A_imag = math.pi * jnp.broadcast_to(
            jnp.arange(N2, dtype=jnp.float32), (H, N2))
        D = jax.random.normal(keys[3], (H,), dtype=jnp.float32)
        W = (jax.random.normal(keys[4], (2 * H, H), dtype=jnp.float32)
             / math.sqrt(H))                              # Conv1d(H, 2H, k=1) weight
        bk = 1.0 / math.sqrt(H)
        bconv = jax.random.uniform(keys[5], (2 * H,), dtype=jnp.float32,
                                   minval=-bk, maxval=bk)  # Conv1d bias
        gamma = jnp.ones((H,), dtype=jnp.float32)          # LayerNorm weight
        beta = jnp.zeros((H,), dtype=jnp.float32)          # LayerNorm bias
        params.append(dict(log_dt=log_dt, C_re=C_re, C_im=C_im,
                           log_A_real=log_A_real, A_imag=A_imag, D=D,
                           W=W, bconv=bconv, gamma=gamma, beta=beta))
    return params


def materialize_ssm_kernel(p, L):
    """S4DKernel.forward: Vandermonde -> k (H, L).  (complex math, plain JAX)"""
    dt = jnp.exp(p["log_dt"])                                  # (H,)
    C = p["C_re"] + 1j * p["C_im"]                             # (H, N/2)
    A = -jnp.exp(p["log_A_real"]) + 1j * p["A_imag"]           # (H, N/2)
    dtA = A * dt[:, None]
    K = dtA[:, :, None] * jnp.arange(L, dtype=jnp.float32)     # (H, N/2, L)
    Cmod = C * (jnp.exp(dtA) - 1.0) / A
    return 2.0 * jnp.real(jnp.einsum("hn,hnl->hl", Cmod, jnp.exp(K)))  # (H, L)


# ----------------------------------------------------------------------------
# S4Layer.forward (prenorm=False, eval mode)
# ----------------------------------------------------------------------------
def s4_layer_forward(x, params, *, b_tile=None):
    """x: (B, L, d_input) with d_input == d_model.  Returns (B, L, d_model)."""
    u = jnp.transpose(x, (0, 2, 1)).astype(jnp.float32)        # (B, H, L)
    B, H, L = u.shape
    k = jnp.stack([materialize_ssm_kernel(p, L) for p in params])        # (nl, H, L)
    D = jnp.stack([p["D"] for p in params])[:, :, None]                  # (nl, H, 1)
    W = jnp.stack([p["W"] for p in params]).astype(jnp.bfloat16)         # (nl, 2H, H)
    bc = jnp.stack([p["bconv"] for p in params])[:, :, None]             # (nl, 2H, 1)
    g = jnp.stack([p["gamma"] for p in params])[:, :, None]              # (nl, H, 1)
    bt = jnp.stack([p["beta"] for p in params])[:, :, None]              # (nl, H, 1)
    y = s4_stack(u, k.astype(jnp.float32), D.astype(jnp.float32), W,
                 bc.astype(jnp.float32), g.astype(jnp.float32),
                 bt.astype(jnp.float32), b_tile=b_tile)
    return jnp.transpose(y, (0, 2, 1))                         # (B, L, H)


# ----------------------------------------------------------------------------
# Pure-JAX f32 reference of the same forward (validation only)
# ----------------------------------------------------------------------------
def s4_layer_reference(x, params):
    u = jnp.transpose(x, (0, 2, 1)).astype(jnp.float32)        # (B, H, L)
    B, H, L = u.shape
    idx = jnp.arange(L)
    diff = idx[:, None] - idx[None, :]                          # (l, j) -> l - j
    for p in params:
        k = materialize_ssm_kernel(p, L)                        # (H, L)
        T = jnp.where(diff[None] >= 0, k[:, jnp.clip(diff, 0, L - 1)], 0.0)
        y = jnp.einsum("bhj,hlj->bhl", u, T)                    # causal conv
        y = y + u * p["D"][None, :, None]
        y = _gelu(y)
        v = jnp.einsum("oh,bhl->bol", p["W"], y) + p["bconv"][None, :, None]
        z = v[:, :H] * jax.nn.sigmoid(v[:, H:])
        xn = z + u
        mean = jnp.mean(xn, axis=1, keepdims=True)
        xc = xn - mean
        var = jnp.mean(xc * xc, axis=1, keepdims=True)
        u = (p["gamma"][None, :, None] * xc * jax.lax.rsqrt(var + 1e-5)
             + p["beta"][None, :, None])
    return jnp.transpose(u, (0, 2, 1))


if __name__ == "__main__":
    key = jax.random.PRNGKey(0)
    kx, kp = jax.random.split(key)

    # L a multiple of 128 (lane-dense), H a multiple of 8.
    B, L, d_model, n_layers = 2, 128, 32, 4
    x = jax.random.normal(kx, (B, L, d_model), dtype=jnp.float32)
    params = init_s4_layer_params(kp, d_model, n_layers)

    out = s4_layer_forward(x, params)
    out = jax.block_until_ready(out)
    assert out.shape == (B, L, d_model)
    assert bool(jnp.all(jnp.isfinite(out)))

    # Validate against the pure-JAX f32 reference (bf16 MXU operands give
    # ~1e-2-class deviations; a direction/indexing bug would give O(1)).
    ref = s4_layer_reference(x, params)
    err = float(jnp.max(jnp.abs(out - ref)))
    assert err < 0.2, f"kernel deviates from reference: max abs err = {err}"
    print("KERNEL_OK")
</pallas_src>

<mosaic_0001>
module attributes {stable_mosaic.version = 11 : i64} {
  func.func @kernel(%arg0: i32, %arg1: i32, %arg2: memref<1x64x128xf32, #tpu.memory_space<vmem>>, %arg3: memref<1x32x128xf32, #tpu.memory_space<vmem>>, %arg4: memref<4x32x1xf32, #tpu.memory_space<vmem>>, %arg5: memref<4x64x32xbf16, #tpu.memory_space<vmem>>, %arg6: memref<4x64x1xf32, #tpu.memory_space<vmem>>, %arg7: memref<4x32x1xf32, #tpu.memory_space<vmem>>, %arg8: memref<4x32x1xf32, #tpu.memory_space<vmem>>, %arg9: memref<1x64x128xf32, #tpu.memory_space<vmem>>, %arg10: memref<64x128xf32, #tpu.memory_space<vmem>>) attributes {dimension_semantics = [#tpu.dimension_semantics<parallel>, #tpu.dimension_semantics<arbitrary>], iteration_bounds = array<i64: 1, 4>, scalar_prefetch = 0 : i64, scratch_operands = 1 : i64, tpu.core_type = #tpu.core_type<tc>, window_params = [{transform_indices = @transform_0, window_bounds = array<i64: 1, 64, 128>}, {transform_indices = @transform_1, window_bounds = array<i64: 1, 32, 128>}, {pipeline_mode = #tpu.pipeline_mode<synchronous>, transform_indices = @transform_2, window_bounds = array<i64: 4, 32, 1>}, {pipeline_mode = #tpu.pipeline_mode<synchronous>, transform_indices = @transform_3, window_bounds = array<i64: 4, 64, 32>}, {pipeline_mode = #tpu.pipeline_mode<synchronous>, transform_indices = @transform_4, window_bounds = array<i64: 4, 64, 1>}, {pipeline_mode = #tpu.pipeline_mode<synchronous>, transform_indices = @transform_5, window_bounds = array<i64: 4, 32, 1>}, {pipeline_mode = #tpu.pipeline_mode<synchronous>, transform_indices = @transform_6, window_bounds = array<i64: 4, 32, 1>}, {transform_indices = @transform_7, window_bounds = array<i64: 1, 64, 128>}]} {
    %c0_i32 = arith.constant 0 : i32
    %0 = arith.cmpi eq, %arg1, %c0_i32 : i32
    %1 = arith.extui %0 : i1 to i32
    %c0_i32_0 = arith.constant 0 : i32
    %2 = arith.cmpi ne, %1, %c0_i32_0 : i32
    scf.if %2 {
      %c0_15 = arith.constant 0 : index
      %c0_16 = arith.constant 0 : index
      %c0_17 = arith.constant 0 : index
      %23 = vector.load %arg2[%c0_15, %c0_16, %c0_17] : memref<1x64x128xf32, #tpu.memory_space<vmem>>, vector<1x64x128xf32>
      %24 = vector.shape_cast %23 : vector<1x64x128xf32> to vector<64x128xf32>
      %c0_18 = arith.constant 0 : index
      %c0_19 = arith.constant 0 : index
      %c0_20 = arith.constant 0 : index
      %25 = vector.load %arg9[%c0_18, %c0_19, %c0_20] : memref<1x64x128xf32, #tpu.memory_space<vmem>>, vector<1x64x128xf32>
      %26 = vector.shape_cast %25 : vector<1x64x128xf32> to vector<64x128xf32>
      %27 = vector.shape_cast %24 : vector<64x128xf32> to vector<1x64x128xf32>
      tpu.vector_store %arg9[%c0_18, %c0_19, %c0_20], %27 {strides = array<i32>} : memref<1x64x128xf32, #tpu.memory_space<vmem>>, vector<1x64x128xf32>,
    } else {
    }
    %3 = tpu.iota {dimensions = array<i32: 0>} : vector<128x128xi32>
    %4 = tpu.iota {dimensions = array<i32: 1>} : vector<128x128xi32>
    %5 = arith.cmpi sge, %4, %3 : vector<128x128xi32>
    %c0_i32_1 = arith.constant 0 : i32
    %c32_i32 = arith.constant 32 : i32
    %6 = arith.addi %c0_i32_1, %c32_i32 : i32
    %c1_i32 = arith.constant 1 : i32
    scf.for %arg11 = %c0_i32_1 to %6 step %c1_i32  : i32 {
      %c0_15 = arith.constant 0 : index
      %23 = arith.index_cast %arg11 : i32 to index
      %c0_16 = arith.constant 0 : index
      %24 = vector.load %arg3[%c0_15, %23, %c0_16] : memref<1x32x128xf32, #tpu.memory_space<vmem>>, vector<1x1x128xf32>
      %25 = vector.shape_cast %24 : vector<1x1x128xf32> to vector<1x128xf32>
      %26 = vector.shape_cast %25 : vector<1x128xf32> to vector<1x128xf32>
      %27 = vector.broadcast %26 : vector<1x128xf32> to vector<128x128xf32>
      %c0_i32_17 = arith.constant 0 : i32
      %28 = tpu.dynamic_rotate %27 by %c0_i32_17 dim 1 {stride = 1 : si32, stride_dimension = 0 : si32} : vector<128x128xf32>, i32 -> vector<128x128xf32>
      %cst = arith.constant 0.000000e+00 : f32
      %29 = vector.broadcast %cst : f32 to vector<128x128xf32>
      %30 = arith.select %5, %28, %29 : vector<128x128xi1>, vector<128x128xf32>
      %31 = arith.truncf %30 : vector<128x128xf32> to vector<128x128xbf16>
      %c0_18 = arith.constant 0 : index
      %32 = arith.index_cast %arg11 : i32 to index
      %c0_19 = arith.constant 0 : index
      %33 = tpu.strided_load %arg9[%c0_18, %32, %c0_19] {strides = array<i32: 1, 32, 1>} : memref<1x64x128xf32, #tpu.memory_space<vmem>>, vector<1x2x128xf32>
      %34 = vector.shape_cast %33 : vector<1x2x128xf32> to vector<2x128xf32>
      %35 = arith.truncf %34 : vector<2x128xf32> to vector<2x128xbf16>
      %cst_20 = arith.constant dense<0.000000e+00> : vector<2x128xf32>
      %36 = tpu.matmul %35, %31, %cst_20 {dimension_numbers = #tpu.dot_dimension_numbers<[1], [0], [0], [1], [0, 0, 1, 1], [], []>} : vector<2x128xbf16>, vector<128x128xbf16>, vector<2x128xf32> -> vector<2x128xf32>
      %c2_i32_21 = arith.constant 2 : i32
      %37 = arith.muli %arg11, %c2_i32_21 : i32
      %38 = arith.index_cast %37 : i32 to index
      %c0_22 = arith.constant 0 : index
      %39 = vector.load %arg10[%38, %c0_22] : memref<64x128xf32, #tpu.memory_space<vmem>>, vector<2x128xf32>
      tpu.vector_store %arg10[%38, %c0_22], %36 {strides = array<i32>} : memref<64x128xf32, #tpu.memory_space<vmem>>, vector<2x128xf32>,
    }
    %c32_i32_2 = arith.constant 32 : i32
    %7 = arith.index_cast %arg1 : i32 to index
    %c0 = arith.constant 0 : index
    %c0_3 = arith.constant 0 : index
    %8 = vector.load %arg5[%7, %c0, %c0_3] : memref<4x64x32xbf16, #tpu.memory_space<vmem>>, vector<1x64x32xbf16>
    %9 = vector.shape_cast %8 : vector<1x64x32xbf16> to vector<64x32xbf16>
    %10 = arith.index_cast %arg1 : i32 to index
    %c0_4 = arith.constant 0 : index
    %c0_5 = arith.constant 0 : index
    %11 = vector.load %arg6[%10, %c0_4, %c0_5] : memref<4x64x1xf32, #tpu.memory_space<vmem>>, vector<1x64x1xf32>
    %12 = vector.shape_cast %11 : vector<1x64x1xf32> to vector<64x1xf32>
    %13 = arith.index_cast %arg1 : i32 to index
    %c0_6 = arith.constant 0 : index
    %c0_7 = arith.constant 0 : index
    %14 = vector.load %arg4[%13, %c0_6, %c0_7] : memref<4x32x1xf32, #tpu.memory_space<vmem>>, vector<1x32x1xf32>
    %15 = vector.shape_cast %14 : vector<1x32x1xf32> to vector<32x1xf32>
    %16 = arith.index_cast %arg1 : i32 to index
    %c0_8 = arith.constant 0 : index
    %c0_9 = arith.constant 0 : index
    %17 = vector.load %arg7[%16, %c0_8, %c0_9] : memref<4x32x1xf32, #tpu.memory_space<vmem>>, vector<1x32x1xf32>
    %18 = vector.shape_cast %17 : vector<1x32x1xf32> to vector<32x1xf32>
    %19 = arith.index_cast %arg1 : i32 to index
    %c0_10 = arith.constant 0 : index
    %c0_11 = arith.constant 0 : index
    %20 = vector.load %arg8[%19, %c0_10, %c0_11] : memref<4x32x1xf32, #tpu.memory_space<vmem>>, vector<1x32x1xf32>
    %21 = vector.shape_cast %20 : vector<1x32x1xf32> to vector<32x1xf32>
    %c0_i32_12 = arith.constant 0 : i32
    %c2_i32 = arith.constant 2 : i32
    %22 = arith.addi %c0_i32_12, %c2_i32 : i32
    %c1_i32_13 = arith.constant 1 : i32
    scf.for %arg11 = %c0_i32_12 to %22 step %c1_i32_13  : i32 {
      %c32_i32_15 = arith.constant 32 : i32
      %23 = arith.muli %arg11, %c32_i32_15 : i32
      %24 = tpu.assume_multiple %23, 32 : i32
      %c0_16 = arith.constant 0 : index
      %25 = arith.index_cast %24 : i32 to index
      %c0_17 = arith.constant 0 : index
      %26 = vector.load %arg9[%c0_16, %25, %c0_17] : memref<1x64x128xf32, #tpu.memory_space<vmem>>, vector<1x32x128xf32>
      %27 = vector.shape_cast %26 : vector<1x32x128xf32> to vector<32x128xf32>
      %28 = arith.index_cast %arg11 : i32 to index
      %c0_18 = arith.constant 0 : index
      %29 = tpu.strided_load %arg10[%28, %c0_18] {strides = array<i32: 2, 1>} : memref<64x128xf32, #tpu.memory_space<vmem>>, vector<32x128xf32>
      %30 = vector.broadcast %15 : vector<32x1xf32> to vector<32x128xf32>
      %31 = arith.mulf %30, %27 : vector<32x128xf32>
      %32 = arith.addf %29, %31 : vector<32x128xf32>
      %cst = arith.constant 4.471500e-02 : f32
      %33 = vector.broadcast %cst : f32 to vector<32x128xf32>
      %34 = arith.mulf %33, %32 : vector<32x128xf32>
      %35 = arith.mulf %34, %32 : vector<32x128xf32>
      %36 = arith.mulf %35, %32 : vector<32x128xf32>
      %37 = arith.addf %32, %36 : vector<32x128xf32>
      %cst_19 = arith.constant 1.59576917 : f32
      %38 = vector.broadcast %cst_19 : f32 to vector<32x128xf32>
      %39 = arith.mulf %38, %37 : vector<32x128xf32>
      %40 = arith.negf %39 : vector<32x128xf32>
      %41 = math.exp %40 : vector<32x128xf32>
      %cst_20 = arith.constant 1.000000e+00 : f32
      %42 = vector.broadcast %cst_20 : f32 to vector<32x128xf32>
      %43 = arith.addf %42, %41 : vector<32x128xf32>
      %44 = arith.divf %42, %43 : vector<32x128xf32>
      %45 = arith.mulf %32, %44 : vector<32x128xf32>
      %46 = arith.truncf %45 : vector<32x128xf32> to vector<32x128xbf16>
      %cst_21 = arith.constant dense<0.000000e+00> : vector<64x128xf32>
      %47 = tpu.matmul %9, %46, %cst_21 {dimension_numbers = #tpu.dot_dimension_numbers<[1], [0], [0], [1], [0, 0, 1, 1], [], []>} : vector<64x32xbf16>, vector<32x128xbf16>, vector<64x128xf32> -> vector<64x128xf32>
      %48 = vector.broadcast %12 : vector<64x1xf32> to vector<64x128xf32>
      %49 = arith.addf %47, %48 : vector<64x128xf32>
      %50 = vector.extract_strided_slice %49 {offsets = [0, 0], sizes = [32, 128], strides = [1, 1]} : vector<64x128xf32> to vector<32x128xf32>
      %51 = vector.extract_strided_slice %49 {offsets = [32, 0], sizes = [32, 128], strides = [1, 1]} : vector<64x128xf32> to vector<32x128xf32>
      %52 = arith.negf %51 : vector<32x128xf32>
      %53 = math.exp %52 : vector<32x128xf32>
      %cst_22 = arith.constant 1.000000e+00 : f32
      %54 = vector.broadcast %cst_22 : f32 to vector<32x128xf32>
      %55 = arith.addf %54, %53 : vector<32x128xf32>
      %56 = arith.divf %54, %55 : vector<32x128xf32>
      %57 = arith.mulf %50, %56 : vector<32x128xf32>
      %58 = arith.addf %57, %27 : vector<32x128xf32>
      %cst_23 = arith.constant dense<0.000000e+00> : vector<128xf32>
      %59 = vector.multi_reduction <add>, %58, %cst_23 [0] : vector<32x128xf32> to vector<128xf32>
      %60 = vector.shape_cast %59 : vector<128xf32> to vector<1x128xf32>
      %cst_24 = arith.constant 3.200000e+01 : f32
      %61 = vector.broadcast %cst_24 : f32 to vector<1x128xf32>
      %62 = arith.divf %60, %61 : vector<1x128xf32>
      %63 = vector.broadcast %62 : vector<1x128xf32> to vector<32x128xf32>
      %64 = arith.subf %58, %63 : vector<32x128xf32>
      %65 = arith.mulf %64, %64 : vector<32x128xf32>
      %cst_25 = arith.constant dense<0.000000e+00> : vector<128xf32>
      %66 = vector.multi_reduction <add>, %65, %cst_25 [0] : vector<32x128xf32> to vector<128xf32>
      %67 = vector.shape_cast %66 : vector<128xf32> to vector<1x128xf32>
      %cst_26 = arith.constant 3.200000e+01 : f32
      %68 = vector.broadcast %cst_26 : f32 to vector<1x128xf32>
      %69 = arith.divf %67, %68 : vector<1x128xf32>
      %cst_27 = arith.constant 9.99999974E-6 : f32
      %70 = vector.broadcast %cst_27 : f32 to vector<1x128xf32>
      %71 = arith.addf %69, %70 : vector<1x128xf32>
      %72 = math.rsqrt %71 : vector<1x128xf32>
      %73 = vector.broadcast %72 : vector<1x128xf32> to vector<32x128xf32>
      %74 = arith.mulf %64, %73 : vector<32x128xf32>
      %75 = vector.broadcast %18 : vector<32x1xf32> to vector<32x128xf32>
      %76 = arith.mulf %75, %74 : vector<32x128xf32>
      %77 = vector.broadcast %21 : vector<32x1xf32> to vector<32x128xf32>
      %78 = arith.addf %76, %77 : vector<32x128xf32>
      %c0_28 = arith.constant 0 : index
      %79 = arith.index_cast %24 : i32 to index
      %c0_29 = arith.constant 0 : index
      %80 = vector.load %arg9[%c0_28, %79, %c0_29] : memref<1x64x128xf32, #tpu.memory_space<vmem>>, vector<1x32x128xf32>
      %81 = vector.shape_cast %80 : vector<1x32x128xf32> to vector<32x128xf32>
      %82 = vector.shape_cast %78 : vector<32x128xf32> to vector<1x32x128xf32>
      tpu.vector_store %arg9[%c0_28, %79, %c0_29], %82 {strides = array<i32>} : memref<1x64x128xf32, #tpu.memory_space<vmem>>, vector<1x32x128xf32>,
    }
    %c2_i32_14 = arith.constant 2 : i32
    return
  }
  func.func @transform_0(%arg0: i32, %arg1: i32) -> (i32, i32, i32) {
    %c0_i32 = arith.constant 0 : i32
    %c0_i32_0 = arith.constant 0 : i32
    %c0_i32_1 = arith.constant 0 : i32
    return %arg0, %c0_i32, %c0_i32_0 : i32, i32, i32
  }
  func.func @transform_1(%arg0: i32, %arg1: i32) -> (i32, i32, i32) {
    %c0_i32 = arith.constant 0 : i32
    %c0_i32_0 = arith.constant 0 : i32
    %c0_i32_1 = arith.constant 0 : i32
    return %arg1, %c0_i32, %c0_i32_0 : i32, i32, i32
  }
  func.func @transform_2(%arg0: i32, %arg1: i32) -> (i32, i32, i32) {
    %c0_i32 = arith.constant 0 : i32
    %c0_i32_0 = arith.constant 0 : i32
    %c0_i32_1 = arith.constant 0 : i32
    %c0_i32_2 = arith.constant 0 : i32
    return %c0_i32, %c0_i32_0, %c0_i32_1 : i32, i32, i32
  }
  func.func @transform_3(%arg0: i32, %arg1: i32) -> (i32, i32, i32) {
    %c0_i32 = arith.constant 0 : i32
    %c0_i32_0 = arith.constant 0 : i32
    %c0_i32_1 = arith.constant 0 : i32
    %c0_i32_2 = arith.constant 0 : i32
    return %c0_i32, %c0_i32_0, %c0_i32_1 : i32, i32, i32
  }
  func.func @transform_4(%arg0: i32, %arg1: i32) -> (i32, i32, i32) {
    %c0_i32 = arith.constant 0 : i32
    %c0_i32_0 = arith.constant 0 : i32
    %c0_i32_1 = arith.constant 0 : i32
    %c0_i32_2 = arith.constant 0 : i32
    return %c0_i32, %c0_i32_0, %c0_i32_1 : i32, i32, i32
  }
  func.func @transform_5(%arg0: i32, %arg1: i32) -> (i32, i32, i32) {
    %c0_i32 = arith.constant 0 : i32
    %c0_i32_0 = arith.constant 0 : i32
    %c0_i32_1 = arith.constant 0 : i32
    %c0_i32_2 = arith.constant 0 : i32
    return %c0_i32, %c0_i32_0, %c0_i32_1 : i32, i32, i32
  }
  func.func @transform_6(%arg0: i32, %arg1: i32) -> (i32, i32, i32) {
    %c0_i32 = arith.constant 0 : i32
    %c0_i32_0 = arith.constant 0 : i32
    %c0_i32_1 = arith.constant 0 : i32
    %c0_i32_2 = arith.constant 0 : i32
    return %c0_i32, %c0_i32_0, %c0_i32_1 : i32, i32, i32
  }
  func.func @transform_7(%arg0: i32, %arg1: i32) -> (i32, i32, i32) {
    %c0_i32 = arith.constant 0 : i32
    %c0_i32_0 = arith.constant 0 : i32
    %c0_i32_1 = arith.constant 0 : i32
    return %arg0, %c0_i32, %c0_i32_0 : i32, i32, i32
  }
}

</mosaic_0001>

<bundles_post_ra>
// kernel: tpu_custom_call.1
= control target key start
LH: loop header
LB: loop body
LE: loop exit
PB: predicated region body
PF: predicated region fallthrough
CT: control target
= control target key end

     0   :  { %12 = vsyncpa [#allocation4], 0  ;;  %s1352_s24 = smov 0   ;;  %s1354_s25 = smov 0   ;;  %s1733_s0 = inlined_call_operand.vmem [shape: f32[1,64,128], index: 0, kind: input, shape index: {}]   ;;  %s1734_s1 = inlined_call_operand.vmem [shape: f32[4,32,128], index: 1, kind: input, shape index: {}]   ;;  %s1735_s2 = inlined_call_operand.vmem [shape: f32[4,32,1], index: 2, kind: input, shape index: {}]   ;;  %s1736_s3 = inlined_call_operand.vmem [shape: bf16[4,64,32], index: 3, kind: input, shape index: {}]   ;;  %s1737_s4 = inlined_call_operand.vmem [shape: f32[4,64,1], index: 4, kind: input, shape index: {}]   ;;  %s1738_s5 = inlined_call_operand.vmem [shape: f32[4,32,1], index: 5, kind: input, shape index: {}]   ;;  %s1739_s6 = inlined_call_operand.vmem [shape: f32[4,32,1], index: 6, kind: input, shape index: {}]   ;;  %s1740_s7 = inlined_call_operand.hbm [shape: f32[1,64,128], index: 7, kind: output, shape index: {}]  }
   0x1   :  { %s1356_s26 = smov 0  }
   0x2 LB: > { %s1001_s27 = sadd.s32 4294967295, %s1280_s26   ;;  %s27_s28 = sadd.s32 1, %s1276_s25  ;;  %s1280_s26 = sphi %s1356_s26, %s18_s26   ;;  %s1276_s25 = sphi %s1354_s25, %s1747_s25   ;;  %s1272_s24 = sphi %s1352_s24, %s1746_s24  }
   0x3   : > { %p28_p0 = scmp.ge.s32.totalorder %s27_s28, 4  ;;  %p1005_p1 = scmp.ge.s32.totalorder %s1280_s26, 1 }
   0x4   : > { %p260_p2 = scmp.lt.s32.totalorder %s1280_s26, 5 }
   0x5   : > { %s1749_s28 = smov (%p28_p0, %s27_s28), 0 }
   0x6   : > { %p261_p3 = pnand %p1005_p1, %p260_p2 }
   0x7   : > { %p297_p4 = scmp.lt.s32.totalorder (!%p261_p3), %s1272_s24, 3  ;;  %p1008_p5 = scmp.ne.s32.totalorder (!%p261_p3), %s1272_s24, 0 }
   0x8   : > { %264 = sbr.rel (%p261_p3) target bundleno = 917 (0x395), region = 48 }
   0xf   : > { %s298_s29 = scalar_select %p297_p4, %s1272_s24, 3 }
  0x10   : > { %306 = sbr.rel (%p1008_p5) target bundleno = 23 (0x17), region = 52  ;;  %v307_v0 = vld [vmem:[%s1733_s0] sm:$0xff] (!%p1008_p5)  ;;  %v308_v1 = vld [vmem:[%s1733_s0 + $0x8] sm:$0xff] (!%p1008_p5)  ;;  %v309_v2 = vld [vmem:[%s1733_s0 + $0x10] sm:$0xff] (!%p1008_p5) }
  0x11   : > { %s1063_s30 = sshll.u32 %s298_s29, 5  ;;  %315 = vst [vmem:[#allocation3] sm:$0xff] (!%p1008_p5), %v307_v0  ;;  %316 = vst [vmem:[#allocation3 + $0x8] sm:$0xff] (!%p1008_p5), %v308_v1  ;;  %v310_v3 = vld [vmem:[%s1733_s0 + $0x18] sm:$0xff] (!%p1008_p5)  ;;  %v311_v4 = vld [vmem:[%s1733_s0 + $0x20] sm:$0xff] (!%p1008_p5) }
  0x12   : > { %s1378_s10 = scalar_lea.vmem %s1734_s1, %s1063_s30  ;;  %317 = vst [vmem:[#allocation3 + $0x10] sm:$0xff] (!%p1008_p5), %v309_v2  ;;  %v312_v5 = vld [vmem:[%s1733_s0 + $0x28] sm:$0xff] (!%p1008_p5)  ;;  %318 = vst [vmem:[#allocation3 + $0x18] sm:$0xff] (!%p1008_p5), %v310_v3  ;;  %v313_v6 = vld [vmem:[%s1733_s0 + $0x30] sm:$0xff] (!%p1008_p5) }
  0x13   : > { %319 = vst [vmem:[#allocation3 + $0x20] sm:$0xff] (!%p1008_p5), %v311_v4  ;;  %320 = vst [vmem:[#allocation3 + $0x28] sm:$0xff] (!%p1008_p5), %v312_v5  ;;  %v314_v7 = vld [vmem:[%s1733_s0 + $0x38] sm:$0xff] (!%p1008_p5) }
  0x14   : > { %321 = vst [vmem:[#allocation3 + $0x30] sm:$0xff] (!%p1008_p5), %v313_v6  ;;  %322 = vst [vmem:[#allocation3 + $0x38] sm:$0xff] (!%p1008_p5), %v314_v7 }
  0x17 PF: > { %v323_v8 = vlaneseq  ;;  %s1486_s9 = smov 0  }
  0x19   : > { %v1405_v9 = vshrl.u32 %v323_v8, 7  ;;  %v1407_v10 = vand.u32 127, %v323_v8 }
  0x1b   : > { %v1410_v11 = vadd.s32 8, %v1405_v9  ;;  %v1413_v12 = vadd.s32 16, %v1405_v9  ;;  %v1416_v13 = vadd.s32 24, %v1405_v9  ;;  %v1419_v14 = vadd.s32 32, %v1405_v9 }
  0x1c   : > { %v1422_v15 = vadd.s32 40, %v1405_v9  ;;  %v1425_v16 = vadd.s32 48, %v1405_v9  ;;  %v1428_v17 = vadd.s32 56, %v1405_v9  ;;  %v1431_v18 = vadd.s32 64, %v1405_v9 }
  0x1d   : > { %v1434_v19 = vadd.s32 72, %v1405_v9  ;;  %v1437_v20 = vadd.s32 80, %v1405_v9  ;;  %v1440_v21 = vadd.s32 88, %v1405_v9  ;;  %v1443_v22 = vadd.s32 96, %v1405_v9 }
  0x1e   : > { %v1446_v23 = vadd.s32 104, %v1405_v9  ;;  %v1449_v24 = vadd.s32 112, %v1405_v9  ;;  %v1452_v25 = vadd.s32 120, %v1405_v9  ;;  %vm344_vm2 = vcmp.ge.s32.totalorder %v1407_v10, %v1413_v12 }
  0x1f   : > { %vm345_vm3 = vcmp.ge.s32.totalorder %v1407_v10, %v1416_v13  ;;  %vm346_vm4 = vcmp.ge.s32.totalorder %v1407_v10, %v1419_v14  ;;  %vm347_vm5 = vcmp.ge.s32.totalorder %v1407_v10, %v1422_v15  ;;  %vm348_vm6 = vcmp.ge.s32.totalorder %v1407_v10, %v1425_v16 }
  0x20   : > { %vm349_vm7 = vcmp.ge.s32.totalorder %v1407_v10, %v1428_v17  ;;  %vm350_vm8 = vcmp.ge.s32.totalorder %v1407_v10, %v1431_v18  ;;  %vm351_vm9 = vcmp.ge.s32.totalorder %v1407_v10, %v1434_v19  ;;  %vm352_vm10 = vcmp.ge.s32.totalorder %v1407_v10, %v1437_v20 }
  0x21   : > { %vm353_vm11 = vcmp.ge.s32.totalorder %v1407_v10, %v1440_v21  ;;  %vm354_vm12 = vcmp.ge.s32.totalorder %v1407_v10, %v1443_v22  ;;  %vm355_vm13 = vcmp.ge.s32.totalorder %v1407_v10, %v1446_v23 }
  0x22 LB: >> { %v1290_v26 = vmov 0.0   ;;  %s364_s11 = scalar_lea.vmem %s1378_s10, %s1284_s9  ;;  %s1291_s12 = smov 272   ;;  %vm1303_vm15 = vmmov 0   ;;  %vm1741_vm0 = vcmp.ge.s32.totalorder %v1407_v10, %v1405_v9  ;;  %vm1742_vm1 = vcmp.ge.s32.totalorder %v1407_v10, %v1410_v11  ;;  %s1284_s9 = sphi %s1486_s9, %s363_s9  }
  0x23   : >> { %1080 = vmatprep.subr.bf16.mxu0 %v1290_v26  ;;  %v1009_v27 = vld [vmem:[%s364_s11] ss:$0 sm:$0xff]  ;;  %s1292_s13 = smov 256   ;;  %s1293_s14 = smov 280   ;;  %1096 = vmatprep.mubr.msk.bf16.mxu0 %vm1303_vm15, %v1290_v26  ;;  %vm1010_vm14 = vmpackc.low %vm1742_vm1, %vm1741_vm0  ;;  %vm1744_vm0 = vcmp.ge.s32.totalorder %v1407_v10, %v1452_v25 }
  0x24   : >> { %379 = vrot.lane.b32.xlu1 %v1009_v27, %s1291_s12  ;;  %371 = vrot.lane.b32.xlu0 %v1009_v27, %s1292_s13  ;;  %s1294_s15 = smov 264   ;;  %s1295_s16 = smov 296   ;;  %vm1013_vm15 = vmpackc.low %vm345_vm3, %vm344_vm2 }
  0x25   : >> { %s1296_s17 = smov 288   ;;  %s1297_s18 = smov 312  }
  0x26   : >> { %s1298_s19 = smov 304   ;;  %s1299_s20 = smov 328  }
  0x27   : >> { %s1300_s21 = smov 320   ;;  %s1301_s22 = smov 344  }
  0x28   : >> { %383 = vrot.lane.b32.xlu1 %v1009_v27, %s1293_s14  ;;  %375 = vrot.lane.b32.xlu0 %v1009_v27, %s1294_s15  ;;  %s1302_s23 = smov 336   ;;  %s1304_s29 = smov 360  }
  0x29   : >> { %s1305_s30 = smov 352   ;;  %s1306_s8 = smov 376  }
  0x2a   : >> { %s1307_s11 = smov 368   ;;  %s457_s12 = scalar_lea.vmem [#allocation3], %s1284_s9 }
  0x2b   : >> { %v458_v49 = vld [vmem:[%s457_s12] ss:$32 sm:$0x1]  ;;  %s1034_s13 = sshll.u32 %s1284_s9, 1  ;;  %s363_s9 = sadd.s32 1, %s1284_s9  }
  0x2c   : >> { %391 = vrot.lane.b32.xlu1 %v1009_v27, %s1295_s16  ;;  %387 = vrot.lane.b32.xlu0 %v1009_v27, %s1296_s17  ;;  %v459_v50 = vld [vmem:[%s457_s12] ss:$32 sm:$0x2]  ;;  %s503_s14 = scalar_lea.vmem [#allocation2], %s1034_s13  ;;  %p360_p6 = scmp.ge.s32.totalorder %s363_s9, 32  }
  0x2d   : >> { %v460_v53 = vor.u32 %v459_v50, %v458_v49  ;;  %s1064_s15 = sshll.u32 (%p360_p6), %s1272_s24, 5  ;;  %s1037_s16 = sshll.u32 (%p360_p6), %s1272_s24, 6 }
  0x2e   : > { %s527_s9 = scalar_lea.vmem (%p360_p6), %s1735_s2, %s1064_s15  ;;  %s537_s12 = scalar_lea.vmem (%p360_p6), %s1739_s6, %s1064_s15 }
  0x2f   : >> { %v461_v55 = vpack.c.bf16 %v460_v53, %v460_v53  ;;  %v1601_v12 = vld [vmem:[%s527_s9] sm:$0xff] (%p360_p6)  ;;  %v1603_v13 = vld [vmem:[%s527_s9 + $0x8] sm:$0xff] (%p360_p6)  ;;  %v1608_v14 = vld [vmem:[%s527_s9 + $0x10] sm:$0xff] (%p360_p6)  ;;  %s1628_s13 = smov (%p360_p6), 0  }
  0x30   : >> { %399 = vrot.lane.b32.xlu1 %v1009_v27, %s1297_s18  ;;  %395 = vrot.lane.b32.xlu0 %v1009_v27, %s1298_s19  ;;  %s507_s19 = scalar_lea.vmem (%p360_p6), %s1736_s3, %s1064_s15  ;;  %v1610_v15 = vld [vmem:[%s527_s9 + $0x18] sm:$0xff] (%p360_p6)  ;;  %v1620_v20 = vld [vmem:[%s537_s12] sm:$0xff] (%p360_p6) }
  0x31   : > { %v1563_v60 = vld [vmem:[%s507_s19] sm:$0xf] (%p360_p6)  ;;  %v1565_v61 = vld [vmem:[%s507_s19 + $0x4] sm:$0xf] (%p360_p6)  ;;  %v1567_v62 = vld [vmem:[%s507_s19 + $0x8] sm:$0xf] (%p360_p6) }
  0x32   : > { %v1569_v63 = vld [vmem:[%s507_s19 + $0xc] sm:$0xf] (%p360_p6)  ;;  %v1571_v0 = vld [vmem:[%s507_s19 + $0x10] sm:$0xf] (%p360_p6)  ;;  %v1573_v1 = vld [vmem:[%s507_s19 + $0x14] sm:$0xf] (%p360_p6) }
  0x33   : > { %v1575_v2 = vld [vmem:[%s507_s19 + $0x18] sm:$0xf] (%p360_p6)  ;;  %v1577_v3 = vld [vmem:[%s507_s19 + $0x1c] sm:$0xf] (%p360_p6)  ;;  %v1622_v21 = vld [vmem:[%s537_s12 + $0x8] sm:$0xff] (%p360_p6) }
  0x34   : >> { %407 = vrot.lane.b32.xlu1 %v1009_v27, %s1299_s20  ;;  %403 = vrot.lane.b32.xlu0 %v1009_v27, %s1300_s21  ;;  %v1624_v22 = vld [vmem:[%s537_s12 + $0x10] sm:$0xff] (%p360_p6)  ;;  %v1626_v23 = vld [vmem:[%s537_s12 + $0x18] sm:$0xff] (%p360_p6) }
  0x38   : >> { %415 = vrot.lane.b32.xlu1 %v1009_v27, %s1301_s22  ;;  %411 = vrot.lane.b32.xlu0 %v1009_v27, %s1302_s23  ;;  %s517_s22 = scalar_lea.vmem (%p360_p6), %s1737_s4, %s1037_s16 }
  0x39   : > { %v1579_v4 = vld [vmem:[%s517_s22] sm:$0xff] (%p360_p6)  ;;  %v1584_v5 = vld [vmem:[%s517_s22 + $0x8] sm:$0xff] (%p360_p6)  ;;  %v1586_v6 = vld [vmem:[%s517_s22 + $0x10] sm:$0xff] (%p360_p6) }
  0x3a   : > { %v1588_v7 = vld [vmem:[%s517_s22 + $0x18] sm:$0xff] (%p360_p6)  ;;  %v1593_v8 = vld [vmem:[%s517_s22 + $0x20] sm:$0xff] (%p360_p6)  ;;  %v1595_v9 = vld [vmem:[%s517_s22 + $0x28] sm:$0xff] (%p360_p6) }
  0x3b   : > { %v1599_v11 = vld [vmem:[%s517_s22 + $0x38] sm:$0xff] (%p360_p6) }
  0x3c   : >> { %423 = vrot.lane.b32.xlu1 %v1009_v27, %s1304_s29  ;;  %419 = vrot.lane.b32.xlu0 %v1009_v27, %s1305_s30  ;;  %s532_s30 = scalar_lea.vmem (%p360_p6), %s1738_s5, %s1064_s15 }
  0x3d   : > { %v1612_v16 = vld [vmem:[%s532_s30] sm:$0xff] (%p360_p6)  ;;  %v1614_v17 = vld [vmem:[%s532_s30 + $0x8] sm:$0xff] (%p360_p6)  ;;  %v1616_v18 = vld [vmem:[%s532_s30 + $0x10] sm:$0xff] (%p360_p6) }
  0x3e   : > { %v1618_v19 = vld [vmem:[%s532_s30 + $0x18] sm:$0xff] (%p360_p6) }
  0x40   : >> { %431 = vrot.lane.b32.xlu1 %v1009_v27, %s1306_s8  ;;  %427 = vrot.lane.b32.xlu0 %v1009_v27, %s1307_s11 }
  0x96   : >> { %v380_v28 = vpop.permute.xlu1 %379  ;;  %v372_v29 = vpop.permute.xlu0 %371 }
  0x9a   : >> { %v384_v30 = vpop.permute.xlu1 %383  ;;  %v376_v31 = vpop.permute.xlu0 %375 }
  0x9b   : >> { %v1011_v32 = vpack.c.bf16 %v376_v31, %v372_v29  ;;  %v1014_v35 = vpack.c.bf16 %v384_v30, %v380_v28 }
  0x9d   : >> { %1081 = vmatpush3.bf16.msk.msra.mxu0 %vm1010_vm14, %v1011_v32  ;;  %vm1016_vm14 = vmpackc.low %vm347_vm5, %vm346_vm4 }
  0x9e   : >> { %1082 = vmatprep.subr.bf16.mxu0 %v1290_v26  ;;  %v392_v33 = vpop.permute.xlu1 %391  ;;  %v388_v34 = vpop.permute.xlu0 %387 }
  0x9f   : >> { %v1017_v36 = vpack.c.bf16 %v392_v33, %v388_v34 }
  0xa1   : >> { %1083 = vmatpush3.bf16.msk.msra.mxu0 %vm1013_vm15, %v1014_v35  ;;  %vm1019_vm15 = vmpackc.low %vm349_vm7, %vm348_vm6 }
  0xa2   : >> { %1084 = vmatprep.subr.bf16.mxu0 %v1290_v26  ;;  %v400_v37 = vpop.permute.xlu1 %399  ;;  %v396_v38 = vpop.permute.xlu0 %395 }
  0xa3   : >> { %v1020_v39 = vpack.c.bf16 %v400_v37, %v396_v38 }
  0xa5   : >> { %1085 = vmatpush3.bf16.msk.msra.mxu0 %vm1016_vm14, %v1017_v36  ;;  %vm1022_vm14 = vmpackc.low %vm351_vm9, %vm350_vm8 }
  0xa6   : >> { %1086 = vmatprep.subr.bf16.mxu0 %v1290_v26  ;;  %v408_v40 = vpop.permute.xlu1 %407  ;;  %v404_v41 = vpop.permute.xlu0 %403 }
  0xa7   : >> { %v1023_v42 = vpack.c.bf16 %v408_v40, %v404_v41 }
  0xa9   : >> { %1087 = vmatpush3.bf16.msk.msra.mxu0 %vm1019_vm15, %v1020_v39  ;;  %vm1025_vm15 = vmpackc.low %vm353_vm11, %vm352_vm10 }
  0xaa   : >> { %1088 = vmatprep.subr.bf16.mxu0 %v1290_v26  ;;  %v416_v43 = vpop.permute.xlu1 %415  ;;  %v412_v44 = vpop.permute.xlu0 %411 }
  0xab   : >> { %v1026_v45 = vpack.c.bf16 %v416_v43, %v412_v44 }
  0xad   : >> { %1089 = vmatpush3.bf16.msk.msra.mxu0 %vm1022_vm14, %v1023_v42  ;;  %vm1028_vm14 = vmpackc.low %vm355_vm13, %vm354_vm12 }
  0xae   : >> { %1090 = vmatprep.subr.bf16.mxu0 %v1290_v26  ;;  %v424_v46 = vpop.permute.xlu1 %423  ;;  %v420_v47 = vpop.permute.xlu0 %419 }
  0xaf   : >> { %v1029_v48 = vpack.c.bf16 %v424_v46, %v420_v47 }
  0xb1   : >> { %1091 = vmatpush3.bf16.msk.msra.mxu0 %vm1025_vm15, %v1026_v45  ;;  %vm1743_vm15 = vcmp.ge.s32.totalorder %v1407_v10, %v1449_v24  ;;  %v1597_v10 = vld [vmem:[%s517_s22 + $0x30] sm:$0xff] (%p360_p6) }
  0xb2   : >> { %1092 = vmatprep.subr.bf16.mxu0 %v1290_v26  ;;  %v432_v51 = vpop.permute.xlu1 %431  ;;  %v428_v52 = vpop.permute.xlu0 %427  ;;  %vm1031_vm1 = vmpackc.low %vm1744_vm0, %vm1743_vm15 }
  0xb3   : >> { %v1032_v54 = vpack.c.bf16 %v432_v51, %v428_v52 }
  0xb5   : >> { %1093 = vmatpush3.bf16.msk.msra.mxu0 %vm1028_vm14, %v1029_v48 }
  0xb6   : >> { %1094 = vmatprep.subr.bf16.mxu0 %v1290_v26 }
  0xb9   : >> { %1095 = vmatpush3.bf16.msk.msra.mxu0 %vm1031_vm1, %v1032_v54 }
  0xbc   : >> { %1097 = vmatmul.mubr.bf16.vlgmr.msra.gmra.mrb[0].mxu0 %v461_v55 }
 0x18c   : > { %362 = sbr.rel (!%p360_p6) target bundleno = 34 (0x22), region = 110 }
 0x18f   : >> { %v496_v56 = vpop.f32.mrb[0].mxu0 }
 0x190   : >> { %504 = vst [vmem:[%s503_s14] sm:$0x3] %v496_v56  ;;  %v1098_v57 = vpop.f32.mrb[1].mxu0 }
 0x191   : >> { %v499_v58 = vpop.f32.mrb[2].mxu0 }
 0x192   : >> { %v1099_v59 = vpop.f32.mrb[3].mxu0 }
 0x193 LB: >> { %v1308_v24 = vmov 0   ;;  %v1047_v25 = vcombine.low %v1563_v60, %v1565_v61  ;;  %vm700_vm0 = vcmask 261120   ;;  %v1049_v26 = vcombine.low %v1571_v0, %v1573_v1  ;;  %s1039_s14 = sshll.u32 %s1288_s13, 5  ;;  %s554_s16 = scalar_lea.vmem [#allocation2], %s1288_s13  ;;  %s1288_s13 = sphi %s1628_s13, %s547_s13  }
 0x194   : >> { %1185 = vset.pattern.permute.xlu1 %v1308_v24  ;;  %1184 = vset.pattern.permute.xlu0 %v1308_v24  ;;  %s1660_s15 = scalar_lea.vmem [#allocation3], %s1039_s14  ;;  %s547_s13 = sadd.s32 1, %s1288_s13  }
 0x195   : >> { %574 = vperm.xlu1 %1185, %v1608_v14   ;;  %564 = vperm.xlu0 %1184, %v1601_v12   ;;  %v1663_v27 = vld [vmem:[%s1660_s15 + $0x10] sm:$0xff]  ;;  %v1666_v28 = vld [vmem:[%s1660_s15] sm:$0xff]  ;;  %v1672_v35 = vld [vmem:[%s1660_s15 + $0x18] sm:$0xff]  ;;  %p544_p7 = scmp.ge.s32.totalorder %s547_s13, 2  }
 0x196   : >> { %1104 = vmatprep.mubr.msk.bf16.mxu0 %vm700_vm0, %v1047_v25  ;;  %1108 = vmatprep.mubr.msk.bf16.mxu1 %vm700_vm0, %v1049_v26  ;;  %v1675_v36 = vld [vmem:[%s1660_s15 + $0x8] sm:$0xff]  ;;  %p1698_p8 = scmp.eq.s32.totalorder (%p544_p7), %s1001_s27, 3  ;;  %s1309_s18 = smov (%p544_p7), [#allocation3]  }
 0x197   : >> { %v1041_v30 = vld [vmem:[%s554_s16 + $0x20] ss:$2 sm:$0xff]  ;;  %v1042_v40 = vld [vmem:[%s554_s16 + $0x30] ss:$2 sm:$0xff]  ;;  %s906_s19 = sshll.u32 (%p544_p7), %s1309_s18, 4  ;;  %s907_s19 = int_to_ptr.vmem [resolvable:$true] %s906_s19 }
 0x198   : >> { %v555_v32 = vld [vmem:[%s554_s16] ss:$2 sm:$0xff]  ;;  %v1040_v42 = vld [vmem:[%s554_s16 + $0x10] ss:$2 sm:$0xff]  ;;  %s1220_s20 = scalar_lea.vmem (%p544_p7), %s907_s19, 1024  ;;  %p1227_p12 = scmp.lt.s32.totalorder (%p544_p7), %s907_s19, %s907_s19 }
 0x199   : >> { %579 = vperm.xlu1 %1185, %v1610_v15   ;;  %569 = vperm.xlu0 %1184, %v1603_v13   ;;  %p1221_p9 = scmp.ne.s32.totalorder (%p544_p7), %s907_s19, %s1220_s20  ;;  %p1228_p13 = scmp.lt.s32.totalorder (%p544_p7), %s1220_s20, %s1220_s20 }
 0x19b   : > { %p1222_p10 = pnand (%p544_p7), %p1221_p9, %p1698_p8  ;;  %p1229_p0 = por (%p544_p7), %p1228_p13, %p1227_p12 }
 0x19d   : >> { %667 = vperm.xlu1 %1185, %v1595_v9   ;;  %662 = vperm.xlu0 %1184, %v1593_v8   ;;  %p1223_p11 = pneg (%p544_p7), %p1222_p10 }
 0x19f   : > { %p1230_p1 = pnand (%p544_p7), %p1229_p0, %p1223_p11 }
 0x1a1   : >> { %677 = vperm.xlu1 %1185, %v1599_v11   ;;  %672 = vperm.xlu0 %1184, %v1597_v10  }
 0x1a5   : >> { %647 = vperm.xlu1 %1185, %v1584_v5   ;;  %642 = vperm.xlu0 %1184, %v1579_v4  }
 0x1a9   : >> { %657 = vperm.xlu1 %1185, %v1588_v7   ;;  %652 = vperm.xlu0 %1184, %v1586_v6  }
 0x1ad   : >> { %852 = vperm.xlu1 %1185, %v1614_v17   ;;  %847 = vperm.xlu0 %1184, %v1612_v16  }
 0x1b1   : >> { %862 = vperm.xlu1 %1185, %v1618_v19   ;;  %857 = vperm.xlu0 %1184, %v1616_v18  }
 0x1b5   : >> { %876 = vperm.xlu1 %1185, %v1622_v21   ;;  %871 = vperm.xlu0 %1184, %v1620_v20  }
 0x1b9   : >> { %886 = vperm.xlu1 %1185, %v1626_v23   ;;  %881 = vperm.xlu0 %1184, %v1624_v22  }
 0x214   : >> { %v575_v29 = vpop.permute.xlu1 %574  ;;  %v565_v31 = vpop.permute.xlu0 %564 }
 0x215   : >> { %v584_v33 = vmul.f32 %v575_v29, %v1663_v27  ;;  %v582_v34 = vmul.f32 %v565_v31, %v1666_v28 }
 0x217   : >> { %v588_v37 = vadd.f32 %v1041_v30, %v584_v33  ;;  %v586_v38 = vadd.f32 %v582_v34, %v555_v32 }
 0x218   : >> { %v580_v39 = vpop.permute.xlu1 %579  ;;  %v570_v41 = vpop.permute.xlu0 %569 }
 0x219   : >> { %v592_v43 = vmul.f32 0.044715, %v588_v37  ;;  %v590_v44 = vmul.f32 0.044715, %v586_v38  ;;  %v585_v45 = vmul.f32 %v580_v39, %v1672_v35  ;;  %v583_v46 = vmul.f32 %v570_v41, %v1675_v36 }
 0x21b   : >> { %v596_v47 = vmul.f32 %v592_v43, %v588_v37  ;;  %v594_v48 = vmul.f32 %v590_v44, %v586_v38  ;;  %v589_v49 = vadd.f32 %v1042_v40, %v585_v45  ;;  %v587_v50 = vadd.f32 %v1040_v42, %v583_v46 }
 0x21d   : >> { %v600_v51 = vmul.f32 %v596_v47, %v588_v37  ;;  %v598_v52 = vmul.f32 %v594_v48, %v586_v38  ;;  %v593_v53 = vmul.f32 0.044715, %v589_v49  ;;  %v591_v54 = vmul.f32 0.044715, %v587_v50 }
 0x21f   : >> { %v604_v55 = vadd.f32 %v600_v51, %v588_v37  ;;  %v602_v56 = vadd.f32 %v598_v52, %v586_v38  ;;  %v597_v57 = vmul.f32 %v593_v53, %v589_v49  ;;  %v595_v58 = vmul.f32 %v591_v54, %v587_v50 }
 0x221   : >> { %v1045_v59 = vmul.f32 -1.5957692, %v604_v55  ;;  %v1043_v24 = vmul.f32 -1.5957692, %v602_v56  ;;  %v601_v25 = vmul.f32 %v597_v57, %v589_v49  ;;  %v599_v26 = vmul.f32 %v595_v58, %v587_v50 }
 0x223   : >> { %v618_v29 = vmul.f32 1.442695, %v1045_v59  ;;  %v614_v30 = vmul.f32 1.442695, %v1043_v24  ;;  %v605_v31 = vadd.f32 %v601_v25, %v589_v49  ;;  %v603_v32 = vadd.f32 %v599_v26, %v587_v50 }
 0x224   : >> { %v1048_v25 = vcombine.low %v1567_v62, %v1569_v63  ;;  %v1050_v26 = vcombine.low %v1575_v2, %v1577_v3 }
 0x225   : >> { %1186 = vpow2.f32 %v618_v29  ;;  %v1046_v33 = vmul.f32 -1.5957692, %v605_v31  ;;  %v1044_v34 = vmul.f32 -1.5957692, %v603_v32 }
 0x226   : >> { %1188 = vpow2.f32 %v614_v30 }
 0x227   : >> { %v620_v39 = vmul.f32 1.442695, %v1046_v33  ;;  %v616_v40 = vmul.f32 1.442695, %v1044_v34 }
 0x229   : >> { %1190 = vpow2.f32 %v620_v39 }
 0x22a   : >> { %1192 = vpow2.f32 %v616_v40 }
 0x22f   : >> { %v1187_v41 = vpop.eup %1186 }
 0x230   : >> { %v1189_v42 = vpop.eup %1188  ;;  %v624_v43 = vadd.f32 1.0, %v1187_v41 }
 0x231   : >> { %v622_v44 = vadd.f32 1.0, %v1189_v42 }
 0x232   : >> { %1194 = vrcp.f32 %v624_v43 }
 0x233   : >> { %v1191_v45 = vpop.eup %1190  ;;  %1196 = vrcp.f32 %v622_v44 }
 0x234   : >> { %v1193_v46 = vpop.eup %1192  ;;  %v625_v47 = vadd.f32 1.0, %v1191_v45 }
 0x235   : >> { %v623_v48 = vadd.f32 1.0, %v1193_v46 }
 0x236   : >> { %1198 = vrcp.f32 %v625_v47 }
 0x237   : >> { %1200 = vrcp.f32 %v623_v48 }
 0x23c   : >> { %v1195_v51 = vpop.eup %1194 }
 0x23d   : >> { %v1197_v52 = vpop.eup %1196  ;;  %v636_v59 = vmul.f32 %v1195_v51, %v588_v37  ;;  %v668_v37 = vpop.permute.xlu1 %667 }
 0x23e   : >> { %v634_v55 = vmul.f32 %v1197_v52, %v586_v38  ;;  %v663_v38 = vpop.permute.xlu0 %662 }
 0x240   : >> { %v1199_v53 = vpop.eup %1198 }
 0x241   : >> { %v1201_v54 = vpop.eup %1200  ;;  %v637_v57 = vmul.f32 %v1199_v53, %v589_v49  ;;  %v678_v49 = vpop.permute.xlu1 %677 }
 0x242   : >> { %v635_v56 = vmul.f32 %v1201_v54, %v587_v50  ;;  %v673_v50 = vpop.permute.xlu0 %672 }
 0x243   : >> { %v639_v24 = vpack.c.bf16 %v637_v57, %v636_v59 }
 0x244   : >> { %v638_v58 = vpack.c.bf16 %v635_v56, %v634_v55 }
 0x246   : >> { %1100 = vmatprep.subr.bf16.mxu0 %v638_v58  ;;  %1112 = vmatprep.subr.bf16.mxu1 %v638_v58  ;;  %v643_v59 = vpop.permute.xlu0 %642 }
 0x247   : >> { %1101 = vmatpush3.bf16.msra.mxu0 %v638_v58  ;;  %1114 = vmatpush3.bf16.msra.mxu1 %v638_v58 }
 0x248   : >> { %1102 = vmatprep.subr.bf16.mxu0 %v639_v24  ;;  %1113 = vmatprep.subr.bf16.mxu1 %v639_v24 }
 0x24b   : >> { %1103 = vmatpush3.bf16.msra.mxu0 %v639_v24  ;;  %1115 = vmatpush3.bf16.msra.mxu1 %v639_v24  ;;  %v648_v24 = vpop.permute.xlu1 %647 }
 0x24e   : >> { %1105 = vmatmul.mubr.msk.bf16.vlgmr.msra.gmra.mrb[0].mxu0 %vm700_vm0, %v1048_v25  ;;  %1109 = vmatmul.mubr.msk.bf16.vlgmr.msra.gmra.mrb[0].mxu1 %vm700_vm0, %v1050_v26  ;;  %v653_v25 = vpop.permute.xlu0 %652 }
 0x321   : >> { %v1106_v29 = vpop.f32.mrb[0].mxu0  ;;  %v1110_v30 = vpop.f32.mrb[0].mxu1 }
 0x322   : >> { %v772_v31 = vadd.f32 %v1110_v30, %v673_v50  ;;  %v747_v32 = vpop.f32.mrb[1].mxu0  ;;  %v763_v33 = vpop.f32.mrb[1].mxu1  ;;  %v756_v26 = vadd.f32 %v1106_v29, %v653_v25 }
 0x323   : >> { %v764_v34 = vadd.f32 %v763_v33, %v663_v38  ;;  %v1107_v39 = vpop.f32.mrb[2].mxu0  ;;  %v1111_v40 = vpop.f32.mrb[2].mxu1 }
 0x324   : >> { %v1057_v41 = vmul.f32 -1.442695, %v772_v31  ;;  %v775_v42 = vadd.f32 %v1111_v40, %v678_v49  ;;  %v750_v43 = vpop.f32.mrb[3].mxu0  ;;  %v766_v44 = vpop.f32.mrb[3].mxu1  ;;  %v748_v49 = vadd.f32 %v747_v32, %v643_v59 }
 0x325   : >> { %v1055_v45 = vmul.f32 -1.442695, %v764_v34  ;;  %v767_v46 = vadd.f32 %v766_v44, %v668_v37  ;;  %v658_v38 = vpop.permute.xlu1 %657  ;;  %v751_v40 = vadd.f32 %v750_v43, %v648_v24 }
 0x326   : >> { %1202 = vpow2.f32 %v1057_v41  ;;  %v1058_v47 = vmul.f32 -1.442695, %v775_v42  ;;  %v759_v31 = vadd.f32 %v1107_v39, %v658_v38 }
 0x327   : >> { %1204 = vpow2.f32 %v1055_v45  ;;  %v1056_v48 = vmul.f32 -1.442695, %v767_v46 }
 0x328   : >> { %1206 = vpow2.f32 %v1058_v47 }
 0x329   : >> { %1208 = vpow2.f32 %v1056_v48 }
 0x330   : >> { %v1203_v51 = vpop.eup %1202 }
 0x331   : >> { %v1205_v52 = vpop.eup %1204  ;;  %v792_v53 = vadd.f32 1.0, %v1203_v51 }
 0x332   : >> { %v1207_v54 = vpop.eup %1206  ;;  %v790_v55 = vadd.f32 1.0, %v1205_v52 }
 0x333   : >> { %v1209_v56 = vpop.eup %1208  ;;  %1210 = vrcp.f32 %v792_v53  ;;  %v793_v57 = vadd.f32 1.0, %v1207_v54 }
 0x334   : >> { %1212 = vrcp.f32 %v790_v55  ;;  %v791_v58 = vadd.f32 1.0, %v1209_v56 }
 0x335   : >> { %1214 = vrcp.f32 %v793_v57 }
 0x336   : >> { %1216 = vrcp.f32 %v791_v58 }
 0x33d   : >> { %v1211_v37 = vpop.eup %1210 }
 0x33e   : >> { %v1213_v50 = vpop.eup %1212  ;;  %v804_v30 = vmul.f32 %v1211_v37, %v756_v26 }
 0x33f   : >> { %v1215_v33 = vpop.eup %1214  ;;  %v802_v34 = vmul.f32 %v1213_v50, %v748_v49 }
 0x340   : >> { %v1217_v41 = vpop.eup %1216  ;;  %v805_v42 = vmul.f32 %v1215_v33, %v759_v31  ;;  %v808_v47 = vadd.f32 %v804_v30, %v1663_v27 }
 0x341   : >> { %v803_v44 = vmul.f32 %v1217_v41, %v751_v40  ;;  %v806_v45 = vadd.f32 %v802_v34, %v1666_v28  ;;  %v853_v34 = vpop.permute.xlu1 %852  ;;  %v848_v40 = vpop.permute.xlu0 %847 }
 0x342   : >> { %v809_v29 = vadd.f32 %v805_v42, %v1672_v35 }
 0x343   : >> { %v807_v46 = vadd.f32 %v803_v44, %v1675_v36 }
 0x345   : >> { %v810_v48 = vadd.f32 %v807_v46, %v806_v45  ;;  %v863_v44 = vpop.permute.xlu1 %862 }
 0x347   : >> { %v811_v51 = vadd.f32 %v810_v48, %v808_v47 }
 0x349   : >> { %v812_v32 = vadd.f32 %v811_v51, %v809_v29 }
 0x34b   : >> { %v813_v52 = vrot.slane %v812_v32, 4 }
 0x34d   : >> { %v814_v53 = vadd.f32 %v813_v52, %v812_v32 }
 0x34f   : >> { %v815_v39 = vrot.slane %v814_v53, 2 }
 0x351   : >> { %v816_v54 = vadd.f32 %v815_v39, %v814_v53 }
 0x353   : >> { %v817_v55 = vrot.slane %v816_v54, 1 }
 0x355   : >> { %v818_v43 = vadd.f32 %v817_v55, %v816_v54 }
 0x357   : >> { %v820_v56 = vmul.f32 0.03125, %v818_v43 }
 0x359   : >> { %v821_v57 = vsub.f32 %v806_v45, %v820_v56  ;;  %v822_v58 = vsub.f32 %v807_v46, %v820_v56  ;;  %v823_v59 = vsub.f32 %v808_v47, %v820_v56  ;;  %v824_v28 = vsub.f32 %v809_v29, %v820_v56  ;;  %v858_v45 = vpop.permute.xlu0 %857  ;;  %v877_v46 = vpop.permute.xlu1 %876 }
 0x35b   : >> { %v825_v24 = vmul.f32 %v821_v57, %v821_v57  ;;  %v826_v36 = vmul.f32 %v822_v58, %v822_v58  ;;  %v827_v25 = vmul.f32 %v823_v59, %v823_v59  ;;  %v828_v26 = vmul.f32 %v824_v28, %v824_v28 }
 0x35d   : >> { %v829_v27 = vadd.f32 %v826_v36, %v825_v24  ;;  %v872_v47 = vpop.permute.xlu0 %871  ;;  %v887_v43 = vpop.permute.xlu1 %886 }
 0x35f   : >> { %v830_v37 = vadd.f32 %v829_v27, %v827_v25 }
 0x361   : >> { %v831_v35 = vadd.f32 %v830_v37, %v828_v26  ;;  %v882_v56 = vpop.permute.xlu0 %881 }
 0x363   : >> { %v832_v38 = vrot.slane %v831_v35, 4 }
 0x365   : >> { %v833_v49 = vadd.f32 %v832_v38, %v831_v35 }
 0x367   : >> { %v834_v50 = vrot.slane %v833_v49, 2 }
 0x369   : >> { %v835_v30 = vadd.f32 %v834_v50, %v833_v49 }
 0x36b   : >> { %v836_v31 = vrot.slane %v835_v30, 1 }
 0x36d   : >> { %v837_v33 = vadd.f32 %v836_v31, %v835_v30 }
 0x36f   : >> { %v838_v41 = vmul.f32 0.03125, %v837_v33 }
 0x371   : >> { %v839_v42 = vadd.f32 1e-05, %v838_v41 }
 0x373   : >> { %1218 = vrsqrt.f32 %v839_v42 }
 0x37d   : >> { %v1219_v48 = vpop.eup %1218 }
 0x37e   : >> { %v841_v29 = vmul.f32 %v1219_v48, %v821_v57  ;;  %v842_v51 = vmul.f32 %v1219_v48, %v822_v58  ;;  %v843_v32 = vmul.f32 %v1219_v48, %v823_v59  ;;  %v844_v52 = vmul.f32 %v1219_v48, %v824_v28 }
 0x37f   : > { %546 = sbr.rel (!%p544_p7) target bundleno = 403 (0x193), region = 121 }
 0x380   : >> { %v865_v53 = vmul.f32 %v848_v40, %v841_v29  ;;  %v866_v39 = vmul.f32 %v853_v34, %v842_v51  ;;  %v867_v54 = vmul.f32 %v858_v45, %v843_v32  ;;  %v868_v55 = vmul.f32 %v863_v44, %v844_v52 }
 0x382   : >> { %v889_v24 = vadd.f32 %v872_v47, %v865_v53  ;;  %v890_v36 = vadd.f32 %v877_v46, %v866_v39  ;;  %v891_v25 = vadd.f32 %v882_v56, %v867_v54  ;;  %v892_v27 = vadd.f32 %v887_v43, %v868_v55 }
 0x384   : >> { %893 = vst [vmem:[%s1660_s15] sm:$0xff] %v889_v24  ;;  %894 = vst [vmem:[%s1660_s15 + $0x8] sm:$0xff] %v890_v36 }
 0x385   : >> { %895 = vst [vmem:[%s1660_s15 + $0x10] sm:$0xff] %v891_v25  ;;  %896 = vst [vmem:[%s1660_s15 + $0x18] sm:$0xff] %v892_v27 }
 0x386   : > { %1233 = shalt.err (!%p1230_p1)
}
 0x387   : > { %s1234_s27 = scalar_lea.hbm %s1740_s7, 1024 }
 0x388   : > { %p1235_p2 = scmp.ne.s32.totalorder %s1740_s7, %s1234_s27  ;;  %p1240_p5 = scmp.lt.u32.totalorder %s1234_s27, %s1740_s7 }
 0x38a   : > { %p1236_p3 = pnand %p1235_p2, %p1698_p8 }
 0x38c   : > { %p1237_p4 = pneg %p1236_p3 }
 0x38e   : > { %p1242_p6 = pnand %p1240_p5, %p1237_p4 }
 0x390   : > { %1245 = shalt.err (!%p1242_p6)
}
 0x391   : > { %s1310_s29 = smov 128   ;;  %s1311_s30 = smov 8  }
 0x392   : > { %1117 = dma.vmem_to_hbm [thread:$0]  (%p1698_p8), %s907_s19, 1024, %s1740_s7, [#allocation4], %s1310_s29, %s1310_s29, %s1311_s30  }
 0x393   : > { %1267 = dma.done.wait (%p1698_p8), [#allocation4], 1024  }
 0x394   : > { %1269 = vsyncadd (%p1698_p8), [#allocation4], 4294966272 }
 0x395 PF: > { %s18_s26 = sadd.s32 1, %s1280_s26   ;;  %s1746_s24 = smov %s1276_s25 }
 0x396   : > { %p15_p7 = scmp.ge.s32.totalorder %s18_s26, 6   ;;  %s1747_s25 = smov %s1749_s28 }
 0x398   :  { %17 = sbr.rel (!%p15_p7) target bundleno = 2 (0x2), region = 132 }
 0x39f   :  { %922 = vsyncpa [#allocation4], 1 }
 0x3a0   :  { %924 = vsyncpa [#allocation4 + $0x1], 1 }

</bundles_post_ra>
